<compile_context>
chip_gen: v6e
topology: v6e:2x2x1
jax: 0.10.0
libtpu: 0.0.40
codegen_flags: <defaults>
</compile_context>

<pallas_src>
import functools

import jax
import jax.numpy as jnp
import numpy as np
from jax import lax
from jax.experimental import pallas as pl
from jax.experimental.pallas import tpu as pltpu

MASK_VALUE = -1e30  # finite mask value: avoids -inf arithmetic in the online softmax


def _mla_proj_kernel(x_ref, wdkv_ref, wq_ref, ckv_ref, q_ref, *, H, dc):
    """grid = (B, n_s_tiles).  All heads batched into a single MXU matmul per step.

    x_ref:    [1, ts, D]      bf16
    wdkv_ref: [D, dc]         bf16  (constant index_map -> fetched once)
    wq_ref:   [D, H*dc]       bf16  absorbed-Q, scale pre-folded, heads along N
    ckv_ref:  [1, ts, dc]     bf16
    q_ref:    [1, H, ts, dc]  bf16  (heads-major layout for the flash kernel)
    """
    x_t = x_ref[0]  # [ts, D]

    ckv = jnp.dot(x_t, wdkv_ref[...], preferred_element_type=jnp.float32)
    ckv_ref[0] = ckv.astype(ckv_ref.dtype)

    # One wide matmul for all heads: [ts, D] x [D, H*dc].
    q_all = jnp.dot(x_t, wq_ref[...], preferred_element_type=jnp.float32)

    # Split heads with static, lane-aligned slices (dc % 128 == 0): pure vreg
    # placement, no XLU shuffles.  Gives the flash kernel a free [H*tq, dc] reshape.
    for h in range(H):
        q_ref[0, h] = q_all[:, h * dc:(h + 1) * dc].astype(q_ref.dtype)


def _mla_flash_kernel(q_ref, ckv_ref, wo_ref, out_ref, m_sc, l_sc, acc_sc,
                      *, tq, tkv, H, dc, D):
    """grid = (B, n_q_tiles, n_kv_tiles); kv is the sequential reduction axis.

    q_ref:   [1, H, tq, dc] bf16   (fetched once per (b, q-tile): index_map is j-invariant)
    ckv_ref: [1, tkv, dc]   bf16   (latent is both K and V; DMA skipped above diagonal)
    wo_ref:  [H*dc, D]      bf16   (constant index_map -> fetched once)
    out_ref: [1, tq, D]     bf16   (lane-dense: D is a multiple of 128)
    m_sc/l_sc: [H*tq, 1] f32; acc_sc: [H*tq, dc] f32
    """
    qi = pl.program_id(1)
    kj = pl.program_id(2)
    n_kv = pl.num_programs(2)

    q_first = qi * tq
    q_last = qi * tq + (tq - 1)
    k_first = kj * tkv
    k_last = kj * tkv + (tkv - 1)

    @pl.when(kj == 0)
    def _init():
        m_sc[...] = jnp.full_like(m_sc, MASK_VALUE)
        l_sc[...] = jnp.zeros_like(l_sc)
        acc_sc[...] = jnp.zeros_like(acc_sc)

    def _update(masked):
        # Collapse heads into the row dim (layout no-op) so all heads share one matmul.
        q = q_ref[0].reshape(H * tq, dc)        # bf16
        ckv = ckv_ref[0]                        # [tkv, dc] bf16

        # Scores for all heads in ONE MXU matmul: [H*tq, dc] x [dc, tkv]
        # (contract last dims directly -- no .T / XLU transpose of c_kv).
        s = lax.dot_general(q, ckv, (((1,), (1,)), ((), ())),
                            preferred_element_type=jnp.float32)   # [H*tq, tkv] f32

        if masked:
            # Diagonal tile only: build the causal mask.  q positions via a 3-D iota
            # over the tq axis (no integer modulo).
            q_pos = q_first + lax.broadcasted_iota(
                jnp.int32, (H, tq, tkv), 1).reshape(H * tq, tkv)
            k_pos = k_first + lax.broadcasted_iota(jnp.int32, (H * tq, tkv), 1)
            s = jnp.where(k_pos <= q_pos, s, MASK_VALUE)

        # Online softmax update (f32).
        m_prev = m_sc[...]                                          # [H*tq, 1]
        m_new = jnp.maximum(m_prev, jnp.max(s, axis=-1, keepdims=True))
        alpha = jnp.exp(m_prev - m_new)
        p = jnp.exp(s - m_new)                                      # [H*tq, tkv]
        l_sc[...] = alpha * l_sc[...] + jnp.sum(p, axis=-1, keepdims=True)

        # PV for all heads in ONE MXU matmul (bf16 in, f32 accumulate).
        pv = lax.dot_general(p.astype(ckv.dtype), ckv, (((1,), (0,)), ((), ())),
                             preferred_element_type=jnp.float32)    # [H*tq, dc]
        acc_sc[...] = alpha * acc_sc[...] + pv
        m_sc[...] = m_new

    # Interior tile: entirely below the causal diagonal -> no mask work at all.
    @pl.when(k_last <= q_first)
    def _interior():
        _update(masked=False)

    # Diagonal tile: crosses the causal boundary -> apply the mask.
    @pl.when(jnp.logical_and(k_first <= q_last, k_last > q_first))
    def _diag():
        _update(masked=True)

    # Fully-masked tiles (k_first > q_last) do nothing; their ckv DMA is also skipped
    # by the clamped index_map on the ckv BlockSpec.

    @pl.when(kj == n_kv - 1)
    def _finalize():
        inv_l = pl.reciprocal(l_sc[...], approx=True)               # EUP slot, ~free
        o = acc_sc[...] * inv_l                                     # [H*tq, dc] f32
        # Relayout heads into the lane dim ONCE per q tile (static sublane slices at
        # multiples of tq + lane-aligned concat), then a single big-K matmul
        # [tq, H*dc] x [H*dc, D] -- the head sum falls out of the contraction and the
        # [H, tq, D] f32 intermediate of the old batched form disappears.
        o_t = jnp.concatenate(
            [o[h * tq:(h + 1) * tq, :] for h in range(H)], axis=-1)  # [tq, H*dc]
        out = jnp.dot(o_t.astype(wo_ref.dtype), wo_ref[...],
                      preferred_element_type=jnp.float32)            # [tq, D]
        out_ref[0] = out.astype(out_ref.dtype)


def mla_absorbed_forward(x, wq_abs, wdkv, wo_abs, *, scale,
                         ts=256, tq=128, tkv=256, out_dtype=jnp.bfloat16):
    """x: [B,S,D] f32; wq_abs: [D,H,dc]; wdkv: [D,dc]; wo_abs: [H,dc,D].

    Returns [B,S,D] in `out_dtype` (bf16 by default: halves output HBM writeback).
    """
    B, S, D = x.shape
    _, H, dc = wq_abs.shape
    assert S % ts == 0 and S % tq == 0 and S % tkv == 0
    assert D % 128 == 0 and dc % 128 == 0, "lane-dense feature dims expected"

    dt = jnp.bfloat16
    x_b = x.astype(dt)
    # Fold the softmax scale into the absorbed query weights (one-time glue), heads
    # flattened into the N dim so the projection kernel does one wide matmul per step.
    wq_flat = (wq_abs * scale).reshape(D, H * dc).astype(dt)         # [D, H*dc]
    wdkv_b = wdkv.astype(dt)
    wo_flat = wo_abs.reshape(H * dc, D).astype(dt)                   # [H*dc, D]

    vmem_limit = 48 * 1024 * 1024  # > default scoped limit, safe on v5e/v6e/v7x

    # ---- Kernel 1: latent + absorbed-query projection (heads batched) -------------
    n_s = S // ts
    ckv, q = pl.pallas_call(
        functools.partial(_mla_proj_kernel, H=H, dc=dc),
        out_shape=(
            jax.ShapeDtypeStruct((B, S, dc), dt),       # latent c_kv
            jax.ShapeDtypeStruct((B, H, S, dc), dt),    # absorbed, scaled queries
        ),
        grid_spec=pltpu.PrefetchScalarGridSpec(
            num_scalar_prefetch=0,
            grid=(B, n_s),
            in_specs=[
                pl.BlockSpec((1, ts, D), lambda b, si: (b, si, 0)),
                pl.BlockSpec((D, dc), lambda b, si: (0, 0)),
                # Constant index_map -> resident; for production H*dc stream per-head
                # slabs or raise vmem_limit_bytes accordingly.
                pl.BlockSpec((D, H * dc), lambda b, si: (0, 0)),
            ],
            out_specs=[
                pl.BlockSpec((1, ts, dc), lambda b, si: (b, si, 0)),
                pl.BlockSpec((1, H, ts, dc), lambda b, si: (b, 0, si, 0)),
            ],
        ),
        compiler_params=pltpu.CompilerParams(
            dimension_semantics=("parallel", "parallel"),
            vmem_limit_bytes=vmem_limit),
    )(x_b, wdkv_b, wq_flat)

    # ---- Kernel 2: flash attention + fused output projection ----------------------
    n_q = S // tq
    n_kv = S // tkv

    # Advisory cost hint for XLA scheduling (causal -> ~half the KV tiles do work).
    attn_flops = (2 * 2 * B * H * S * S * dc) // 2          # QK^T + PV
    proj_flops = 2 * B * S * (H * dc) * D                   # fused output projection
    cost = pl.CostEstimate(
        flops=int(attn_flops + proj_flops),
        transcendentals=int(B * H * S * S // 2),
        bytes_accessed=int(q.size * 2                        # q read once per q tile
                           + B * S * dc * 2 * max(1, (n_q + 1) // 2)  # causal ckv reads
                           + wo_flat.size * 2
                           + B * S * D * 2),                 # bf16 output writeback
    )

    kernel = functools.partial(_mla_flash_kernel, tq=tq, tkv=tkv, H=H, dc=dc, D=D)
    out = pl.pallas_call(
        kernel,
        out_shape=jax.ShapeDtypeStruct((B, S, D), out_dtype),
        grid_spec=pltpu.PrefetchScalarGridSpec(
            num_scalar_prefetch=0,
            grid=(B, n_q, n_kv),
            in_specs=[
                # j-invariant -> q block fetched once per (b, q-tile).
                pl.BlockSpec((1, H, tq, dc), lambda b, i, j: (b, 0, i, 0)),
                # Clamp above-diagonal KV tiles to the diagonal block index so their
                # DMA is skipped (the pl.when skip already removes the compute).
                # On v5e with small tkv consider pipeline_mode=pl.Buffered(3) here.
                pl.BlockSpec(
                    (1, tkv, dc),
                    lambda b, i, j: (b, jnp.minimum(j, (i * tq + tq - 1) // tkv), 0)),
                # Constant index_map -> DMA'd once (only used on the last KV tile).
                pl.BlockSpec((H * dc, D), lambda b, i, j: (0, 0)),
            ],
            out_specs=pl.BlockSpec((1, tq, D), lambda b, i, j: (b, i, 0)),
            scratch_shapes=[
                pltpu.VMEM((H * tq, 1), jnp.float32),    # running max m
                pltpu.VMEM((H * tq, 1), jnp.float32),    # running denom l
                pltpu.VMEM((H * tq, dc), jnp.float32),   # running weighted V acc
            ],
        ),
        compiler_params=pltpu.CompilerParams(
            dimension_semantics=("parallel", "parallel", "arbitrary"),
            vmem_limit_bytes=vmem_limit),
        cost_estimate=cost,
    )(q, ckv, wo_flat)
    return out


def mla_reference(x, wq_abs, wdkv, wo_abs, *, scale):
    """Plain-JAX f32 reference for verification."""
    B, S, D = x.shape
    _, H, dc = wq_abs.shape
    c = jnp.einsum('bsd,dc->bsc', x, wdkv)                       # [B,S,dc]
    q = jnp.einsum('bsd,dhc->bshc', x, wq_abs)                   # [B,S,H,dc]
    s = jnp.einsum('bshc,btc->bhst', q, c) * scale               # [B,H,S,S]
    row = jnp.arange(S)[:, None]
    col = jnp.arange(S)[None, :]
    s = jnp.where(col <= row, s, -1e30)
    p = jax.nn.softmax(s, axis=-1)
    o = jnp.einsum('bhst,btc->bshc', p, c)                       # [B,S,H,dc]
    return jnp.einsum('bshc,hcd->bsd', o, wo_abs)                # [B,S,D]


if __name__ == "__main__":
    # Small but tile-friendly shapes (lane-dense: D and dc multiples of 128;
    # S = 512 gives multiple q/kv tiles so the causal skip, clamped-DMA reuse,
    # interior/diagonal branches, and online softmax are all exercised).
    B, S, D = 2, 512, 128       # batch, seq, model dim
    H, d_head, dc = 4, 32, 128  # heads, per-head dim (for scale), KV latent dim
    scale = 1.0 / np.sqrt(d_head)

    key = jax.random.PRNGKey(0)
    k_x, k_wq, k_wuk, k_wuv, k_wo, k_wdkv = jax.random.split(key, 6)

    x = jax.random.normal(k_x, (B, S, D), jnp.float32)

    # Un-absorbed MLA parameters (shapes as in a standard MLA block).
    w_q = jax.random.normal(k_wq, (D, H, d_head), jnp.float32) * 0.05    # query up-proj
    w_uk = jax.random.normal(k_wuk, (dc, H, d_head), jnp.float32) * 0.05  # key up-proj
    w_uv = jax.random.normal(k_wuv, (dc, H, d_head), jnp.float32) * 0.05  # value up-proj
    w_o = jax.random.normal(k_wo, (H, d_head, D), jnp.float32) * 0.05    # output proj
    w_dkv = jax.random.normal(k_wdkv, (D, dc), jnp.float32) * 0.05       # KV down-proj

    # Weight absorption (done once, in glue JAX).
    wq_abs = jnp.einsum('dhe,che->dhc', w_q, w_uk)   # [D, H, dc]
    wo_abs = jnp.einsum('che,hed->hcd', w_uv, w_o)   # [H, dc, D]

    out = jax.block_until_ready(
        mla_absorbed_forward(x, wq_abs, w_dkv, wo_abs, scale=scale))

    ref = mla_reference(x, wq_abs, w_dkv, wo_abs, scale=scale)
    # bf16 MXU inputs / bf16 output with f32 accumulation vs pure-f32 reference.
    np.testing.assert_allclose(np.asarray(out, dtype=np.float32), np.asarray(ref),
                               rtol=5e-2, atol=1e-2)

    print("KERNEL_OK")
</pallas_src>

<mosaic_0001>
module attributes {stable_mosaic.version = 11 : i64} {
  func.func @_mla_proj_kernel(%arg0: i32, %arg1: i32, %arg2: memref<1x256x128xbf16, #tpu.memory_space<vmem>>, %arg3: memref<128x128xbf16, #tpu.memory_space<vmem>>, %arg4: memref<128x512xbf16, #tpu.memory_space<vmem>>, %arg5: memref<1x256x128xbf16, #tpu.memory_space<vmem>>, %arg6: memref<1x4x256x128xbf16, #tpu.memory_space<vmem>>) attributes {dimension_semantics = [#tpu.dimension_semantics<parallel>, #tpu.dimension_semantics<parallel>], iteration_bounds = array<i64: 2, 2>, scalar_prefetch = 0 : i64, scratch_operands = 0 : i64, tpu.core_type = #tpu.core_type<tc>, window_params = [{transform_indices = @transform_0, window_bounds = array<i64: 1, 256, 128>}, {pipeline_mode = #tpu.pipeline_mode<synchronous>, transform_indices = @transform_1, window_bounds = array<i64: 128, 128>}, {pipeline_mode = #tpu.pipeline_mode<synchronous>, transform_indices = @transform_2, window_bounds = array<i64: 128, 512>}, {transform_indices = @transform_3, window_bounds = array<i64: 1, 256, 128>}, {transform_indices = @transform_4, window_bounds = array<i64: 1, 4, 256, 128>}]} {
    %c0 = arith.constant 0 : index
    %c0_0 = arith.constant 0 : index
    %c0_1 = arith.constant 0 : index
    %0 = vector.load %arg2[%c0, %c0_0, %c0_1] : memref<1x256x128xbf16, #tpu.memory_space<vmem>>, vector<1x256x128xbf16>
    %1 = vector.shape_cast %0 : vector<1x256x128xbf16> to vector<256x128xbf16>
    %c0_2 = arith.constant 0 : index
    %c0_3 = arith.constant 0 : index
    %2 = vector.load %arg3[%c0_2, %c0_3] : memref<128x128xbf16, #tpu.memory_space<vmem>>, vector<128x128xbf16>
    %cst = arith.constant dense<0.000000e+00> : vector<256x128xf32>
    %3 = tpu.matmul %1, %2, %cst {dimension_numbers = #tpu.dot_dimension_numbers<[1], [0], [0], [1], [0, 0, 1, 1], [], []>} : vector<256x128xbf16>, vector<128x128xbf16>, vector<256x128xf32> -> vector<256x128xf32>
    %4 = arith.truncf %3 : vector<256x128xf32> to vector<256x128xbf16>
    %c0_4 = arith.constant 0 : index
    %c0_5 = arith.constant 0 : index
    %c0_6 = arith.constant 0 : index
    %5 = vector.load %arg5[%c0_4, %c0_5, %c0_6] : memref<1x256x128xbf16, #tpu.memory_space<vmem>>, vector<1x256x128xbf16>
    %6 = vector.shape_cast %5 : vector<1x256x128xbf16> to vector<256x128xbf16>
    %7 = vector.shape_cast %4 : vector<256x128xbf16> to vector<1x256x128xbf16>
    tpu.vector_store %arg5[%c0_4, %c0_5, %c0_6], %7 {strides = array<i32>} : memref<1x256x128xbf16, #tpu.memory_space<vmem>>, vector<1x256x128xbf16>,
    %c0_7 = arith.constant 0 : index
    %c0_8 = arith.constant 0 : index
    %8 = vector.load %arg4[%c0_7, %c0_8] : memref<128x512xbf16, #tpu.memory_space<vmem>>, vector<128x512xbf16>
    %cst_9 = arith.constant dense<0.000000e+00> : vector<256x512xf32>
    %9 = tpu.matmul %1, %8, %cst_9 {dimension_numbers = #tpu.dot_dimension_numbers<[1], [0], [0], [1], [0, 0, 1, 1], [], []>} : vector<256x128xbf16>, vector<128x512xbf16>, vector<256x512xf32> -> vector<256x512xf32>
    %10 = vector.extract_strided_slice %9 {offsets = [0, 0], sizes = [256, 128], strides = [1, 1]} : vector<256x512xf32> to vector<256x128xf32>
    %11 = arith.truncf %10 : vector<256x128xf32> to vector<256x128xbf16>
    %c0_10 = arith.constant 0 : index
    %c0_11 = arith.constant 0 : index
    %c0_12 = arith.constant 0 : index
    %c0_13 = arith.constant 0 : index
    %12 = vector.load %arg6[%c0_10, %c0_11, %c0_12, %c0_13] : memref<1x4x256x128xbf16, #tpu.memory_space<vmem>>, vector<1x1x256x128xbf16>
    %13 = vector.shape_cast %12 : vector<1x1x256x128xbf16> to vector<256x128xbf16>
    %14 = vector.shape_cast %11 : vector<256x128xbf16> to vector<1x1x256x128xbf16>
    tpu.vector_store %arg6[%c0_10, %c0_11, %c0_12, %c0_13], %14 {strides = array<i32>} : memref<1x4x256x128xbf16, #tpu.memory_space<vmem>>, vector<1x1x256x128xbf16>,
    %15 = vector.extract_strided_slice %9 {offsets = [0, 128], sizes = [256, 128], strides = [1, 1]} : vector<256x512xf32> to vector<256x128xf32>
    %16 = arith.truncf %15 : vector<256x128xf32> to vector<256x128xbf16>
    %c0_14 = arith.constant 0 : index
    %c1 = arith.constant 1 : index
    %c0_15 = arith.constant 0 : index
    %c0_16 = arith.constant 0 : index
    %17 = vector.load %arg6[%c0_14, %c1, %c0_15, %c0_16] : memref<1x4x256x128xbf16, #tpu.memory_space<vmem>>, vector<1x1x256x128xbf16>
    %18 = vector.shape_cast %17 : vector<1x1x256x128xbf16> to vector<256x128xbf16>
    %19 = vector.shape_cast %16 : vector<256x128xbf16> to vector<1x1x256x128xbf16>
    tpu.vector_store %arg6[%c0_14, %c1, %c0_15, %c0_16], %19 {strides = array<i32>} : memref<1x4x256x128xbf16, #tpu.memory_space<vmem>>, vector<1x1x256x128xbf16>,
    %20 = vector.extract_strided_slice %9 {offsets = [0, 256], sizes = [256, 128], strides = [1, 1]} : vector<256x512xf32> to vector<256x128xf32>
    %21 = arith.truncf %20 : vector<256x128xf32> to vector<256x128xbf16>
    %c0_17 = arith.constant 0 : index
    %c2 = arith.constant 2 : index
    %c0_18 = arith.constant 0 : index
    %c0_19 = arith.constant 0 : index
    %22 = vector.load %arg6[%c0_17, %c2, %c0_18, %c0_19] : memref<1x4x256x128xbf16, #tpu.memory_space<vmem>>, vector<1x1x256x128xbf16>
    %23 = vector.shape_cast %22 : vector<1x1x256x128xbf16> to vector<256x128xbf16>
    %24 = vector.shape_cast %21 : vector<256x128xbf16> to vector<1x1x256x128xbf16>
    tpu.vector_store %arg6[%c0_17, %c2, %c0_18, %c0_19], %24 {strides = array<i32>} : memref<1x4x256x128xbf16, #tpu.memory_space<vmem>>, vector<1x1x256x128xbf16>,
    %25 = vector.extract_strided_slice %9 {offsets = [0, 384], sizes = [256, 128], strides = [1, 1]} : vector<256x512xf32> to vector<256x128xf32>
    %26 = arith.truncf %25 : vector<256x128xf32> to vector<256x128xbf16>
    %c0_20 = arith.constant 0 : index
    %c3 = arith.constant 3 : index
    %c0_21 = arith.constant 0 : index
    %c0_22 = arith.constant 0 : index
    %27 = vector.load %arg6[%c0_20, %c3, %c0_21, %c0_22] : memref<1x4x256x128xbf16, #tpu.memory_space<vmem>>, vector<1x1x256x128xbf16>
    %28 = vector.shape_cast %27 : vector<1x1x256x128xbf16> to vector<256x128xbf16>
    %29 = vector.shape_cast %26 : vector<256x128xbf16> to vector<1x1x256x128xbf16>
    tpu.vector_store %arg6[%c0_20, %c3, %c0_21, %c0_22], %29 {strides = array<i32>} : memref<1x4x256x128xbf16, #tpu.memory_space<vmem>>, vector<1x1x256x128xbf16>,
    return
  }
  func.func @transform_0(%arg0: i32, %arg1: i32) -> (i32, i32, i32) {
    %c0_i32 = arith.constant 0 : i32
    %c0_i32_0 = arith.constant 0 : i32
    return %arg0, %arg1, %c0_i32 : i32, i32, i32
  }
  func.func @transform_1(%arg0: i32, %arg1: i32) -> (i32, i32) {
    %c0_i32 = arith.constant 0 : i32
    %c0_i32_0 = arith.constant 0 : i32
    %c0_i32_1 = arith.constant 0 : i32
    return %c0_i32, %c0_i32_0 : i32, i32
  }
  func.func @transform_2(%arg0: i32, %arg1: i32) -> (i32, i32) {
    %c0_i32 = arith.constant 0 : i32
    %c0_i32_0 = arith.constant 0 : i32
    %c0_i32_1 = arith.constant 0 : i32
    return %c0_i32, %c0_i32_0 : i32, i32
  }
  func.func @transform_3(%arg0: i32, %arg1: i32) -> (i32, i32, i32) {
    %c0_i32 = arith.constant 0 : i32
    %c0_i32_0 = arith.constant 0 : i32
    return %arg0, %arg1, %c0_i32 : i32, i32, i32
  }
  func.func @transform_4(%arg0: i32, %arg1: i32) -> (i32, i32, i32, i32) {
    %c0_i32 = arith.constant 0 : i32
    %c0_i32_0 = arith.constant 0 : i32
    %c0_i32_1 = arith.constant 0 : i32
    return %arg0, %c0_i32, %arg1, %c0_i32_0 : i32, i32, i32, i32
  }
}

</mosaic_0001>

<bundles_post_ra>
// kernel: tpu_custom_call.1
= control target key start
LH: loop header
LB: loop body
LE: loop exit
PB: predicated region body
PF: predicated region fallthrough
CT: control target
= control target key end

     0   :  { %s4167_s0 = inlined_call_operand.hbm [shape: bf16[2,512,128], index: 0, kind: input, shape index: {}]   ;;  %s4168_s1 = inlined_call_operand.hbm [shape: bf16[128,128], index: 1, kind: input, shape index: {}]   ;;  %s4169_s2 = inlined_call_operand.hbm [shape: bf16[128,512], index: 2, kind: input, shape index: {}]   ;;  %s4170_s3 = inlined_call_operand.hbm [shape: bf16[2,512,128], index: 3, kind: output, shape index: {0}]   ;;  %s4171_s4 = inlined_call_operand.hbm [shape: bf16[2,4,512,128], index: 4, kind: output, shape index: {1}]  }
   0x1   :  { %4179 = sst [smem:[#allocation20_spill]] %s4168_s1 }
   0x2   :  { %4180 = sst [smem:[#allocation21_spill]] %s4169_s2 }
   0x3   :  { %4181 = sst [smem:[#allocation22_spill]] %s4170_s3 }
   0x4   :  { %4182 = sst [smem:[#allocation23_spill]] %s4171_s4 }
   0x5   :  { %10 = vsyncpa [#allocation3], 0 }
   0x6   :  { %12 = vsyncpa [#allocation3 + $0x1], 0 }
   0x7   :  { %13 = vsyncpa [#allocation6], 0 }
   0x8   :  { %14 = vsyncpa [#allocation4], 0 }
   0x9   :  { %16 = vsyncpa [#allocation4 + $0x1], 0 }
   0xa   :  { %17 = vsyncpa [#allocation10], 0 }
   0xb   :  { %19 = vsyncpa [#allocation10 + $0x1], 0  ;;  %s3709_s15 = smov 0   ;;  %s3711_s16 = smov 0  }
   0xc   :  { %s3713_s17 = smov 0   ;;  %s3715_s18 = smov 0  }
   0xd   :  { %s3717_s19 = smov 0   ;;  %s3719_s20 = smov 0  }
   0xe   :  { %s3721_s21 = smov 0   ;;  %s3723_s22 = smov 0  }
   0xf LB: > { %4183 = sst [smem:[#allocation17_spill]] %s3636_s15  ;;  %s2220_s23 = sadd.s32 4294967295, %s3664_s22   ;;  %s3664_s22 = sphi %s3723_s22, %s25_s22   ;;  %s3660_s21 = sphi %s3721_s21, %s4212_s21   ;;  %s3656_s20 = sphi %s3719_s20, %s4211_s20   ;;  %s3652_s19 = sphi %s3717_s19, %s4210_s19   ;;  %s3648_s18 = sphi %s3715_s18, %s4209_s18   ;;  %s3644_s17 = sphi %s3713_s17, %s4208_s17   ;;  %s3640_s16 = sphi %s3711_s16, %s4207_s16   ;;  %s3636_s15 = sphi %s3709_s15, %s4206_s15  }
  0x10   : > { %s2221_s24 = sadd.s32 4294967294, %s3664_s22   ;;  %p59_p0 = scmp.ne.s32.totalorder %s3640_s16, %s3636_s15 }
  0x11   : > { %p3753_p1 = scmp.eq.s32.totalorder %s2220_s23, 0  ;;  %p3757_p2 = scmp.eq.s32.totalorder %s2220_s23, 3 }
  0x12   : > { %p133_p3 = scmp.eq.s32.totalorder %s2221_s24, 3  ;;  %p2222_p5 = scmp.ge.s32.totalorder %s3664_s22, 1 }
  0x13   : > { %p3763_p4 = por %p3753_p1, %p59_p0  ;;  %p168_p7 = scmp.lt.s32.totalorder %s3664_s22, 5 }
  0x14   : > { %p3768_p6 = por %p133_p3, %p59_p0  ;;  %s3666_s30 = smov [#allocation5]  }
  0x15   : > { %p3773_p8 = pnand %p2222_p5, %p168_p7  ;;  %s180_s5 = sshll.u32 %s3666_s30, 4  ;;  %s181_s5 = int_to_ptr.vmem [resolvable:$true] %s180_s5 }
  0x16   : > { %s4187_s28 = scalar_select %p3768_p6, 1, 0 }
  0x17   : > { %p3304_p9 = pneg %p3773_p8  ;;  %s3667_s7 = smov [#allocation7]  }
  0x18   : > { %4188 = sst [smem:[#allocation18_spill]] %s4187_s28  ;;  %s193_s8 = sshll.u32 %s3667_s7, 4  ;;  %s194_s8 = int_to_ptr.vmem [resolvable:$true] %s193_s8 }
  0x19   : > { %p3781_p10 = pnand %p3304_p9, %p3753_p1  ;;  %s3491_s9 = scalar_lea.vmem %s181_s5, 1024 }
  0x1a   : > { %p3492_p12 = scmp.ne.s32.totalorder %s181_s5, %s3491_s9  ;;  %p3499_p3 = scmp.lt.s32.totalorder %s181_s5, %s181_s5 }
  0x1b   : > { %p3482_p11 = pneg %p3781_p10  ;;  %p3500_p5 = scmp.lt.s32.totalorder %s3491_s9, %s3491_s9 }
  0x1d   : > { %p3494_p13 = pnand %p3492_p12, %p3482_p11  ;;  %p3501_p7 = por %p3500_p5, %p3499_p3 }
  0x1f   : > { %p3495_p0 = pneg %p3494_p13 }
  0x21   : > { %p3502_p9 = pnand %p3501_p7, %p3495_p0 }
  0x23   : > { %3505 = shalt.err (!%p3502_p9)
}
  0x24   : > { %s4172_s10 = smov 64   ;;  %s4173_s11 = smov 4  }
  0x25   : > { %s4191_s1 = sld [smem:[#allocation20_spill]]  ;;  %s3517_s14 = scalar_lea.vmem %s194_s8, 4096 }
  0x26   : > { %p3518_p12 = scmp.ne.s32.totalorder %s194_s8, %s3517_s14  ;;  %p3525_p0 = scmp.lt.s32.totalorder %s194_s8, %s194_s8 }
  0x27   : > { %p3526_p5 = scmp.lt.s32.totalorder %s3517_s14, %s3517_s14 }
  0x28   : > { %p3520_p13 = pnand %p3518_p12, %p3482_p11 }
  0x29   : > { %p3527_p7 = por %p3526_p5, %p3525_p0 }
  0x2a   : > { %p3521_p3 = pneg %p3520_p13 }
  0x2b   : > { %3307 = dma.hbm_to_vmem [thread:$0]  (!%p3781_p10), %s4191_s1, 1024, %s181_s5, [#allocation6], %s4172_s10, %s4172_s10, %s4173_s11  }
  0x2c   : > { %p3528_p9 = pnand %p3527_p7, %p3521_p3 }
  0x2e   : > { %3531 = shalt.err (!%p3528_p9)
}
  0x2f   : > { %s3670_s23 = smov 256   ;;  %s3671_s24 = smov 16  }
  0x30   : > { %s4192_s2 = sld [smem:[#allocation21_spill]]  ;;  %s34_s7 = sadd.s32 1, %s3656_s20 }
  0x31   : > { %s37_s9 = sadd.s32 1, %s3660_s21  ;;  %p35_p11 = scmp.ge.s32.totalorder %s34_s7, 2 }
  0x32   : > { %s46_s12 = sadd.s32 1, %s3644_s17  ;;  %p53_p12 = scmp.ne.s32.totalorder %s3644_s17, %s3640_s16 }
  0x33   : > { %p54_p13 = scmp.eq.s32.totalorder %s3664_s22, 0  ;;  %s4214_s7 = smov (%p35_p11, %s34_s7), 0 }
  0x34   : > { %4193 = sst [smem:[#allocation19_spill]] %s4214_s7  ;;  %s4216_s9 = smov (!%p35_p11, %s37_s9), %s3660_s21 }
  0x35   : > { %s42_s13 = ssub.s32 %s3656_s20, %s4214_s7  ;;  %p3817_p3 = por %p54_p13, %p53_p12 }
  0x36   : > { %3310 = dma.hbm_to_vmem [thread:$0]  (!%p3781_p10), %s4192_s2, 4096, %s194_s8, [#allocation6], %s3670_s23, %s3670_s23, %s3671_s24  }
  0x37   : > { %p39_p10 = scmp.ge.s32.totalorder %s4216_s9, 2  ;;  %p3823_p0 = por %p3757_p2, %p53_p12 }
  0x38   : > { %p3324_p5 = scmp.lt.s32.totalorder %s3664_s22, 4  ;;  %s207_s14 = sand.u32 1, %s3644_s17  }
  0x39   : > { %s4195_s8 = scalar_select %p3823_p0, 1, 0 }
  0x3a   : > { %s4218_s9 = smov (%p39_p10, %s4216_s9), 0  ;;  %s2226_s23 = sshll.u32 %s207_s14, 7 }
  0x3b   : > { %s41_s24 = ssub.s32 %s3660_s21, %s4218_s9  ;;  %s2227_s5 = sshll.u32 %s3656_s20, 5 }
  0x3c   : > { %s43_s30 = sor.u32 %s42_s13, %s41_s24  ;;  %s2228_s10 = sshll.u32 %s3660_s21, 6 }
  0x3d   : > { %p44_p7 = scmp.eq.s32.totalorder %s43_s30, 0  ;;  %s217_s11 = sadd.s32 %s2228_s10, %s2227_s5 }
  0x3e   : > { %s211_s1 = scalar_lea.vmem [#allocation2], %s2226_s23  ;;  %s2229_s7 = sshll.u32 %s217_s11, 6 }
  0x3f   : > { %s220_s26 = sshll.u32 %s211_s1, 4  ;;  %s219_s4 = scalar_lea.hbm %s4167_s0, %s2229_s7  ;;  %s221_s26 = int_to_ptr.vmem [resolvable:$true] %s220_s26 }
  0x40   : > { %s3836_s2 = scalar_select %p44_p7, %s3644_s17, %s46_s12  }
  0x41   : > { %p3845_p2 = pnand %p3324_p5, %p3817_p3  ;;  %s208_s13 = scalar_lea.sflag [#allocation3], %s207_s14 }
  0x42   : > { %s3545_s10 = scalar_lea.vmem %s221_s26, 2048  ;;  %s3672_s1 = smov [#allocation2]  }
  0x43   : > { %p3534_p9 = pneg %p3845_p2  ;;  %p3546_p11 = scmp.ne.s32.totalorder %s221_s26, %s3545_s10 }
  0x44   : > { %s3550_s11 = sshll.u32 %s3672_s1, 4  ;;  %s3551_s11 = int_to_ptr.vmem [resolvable:$false] %s3550_s11 }
  0x45   : > { %p3548_p12 = pnand %p3546_p11, %p3534_p9  ;;  %s3552_s12 = scalar_lea.vmem %s3551_s11, 4096 }
  0x46   : > { %p3553_p10 = scmp.lt.s32.totalorder %s221_s26, %s3551_s11  ;;  %p3554_p7 = scmp.lt.s32.totalorder %s3552_s12, %s3545_s10 }
  0x47   : > { %p3549_p13 = pneg %p3548_p12 }
  0x48   : > { %p3555_p6 = por %p3554_p7, %p3553_p10 }
  0x4a   : > { %p3556_p0 = pnand %p3555_p6, %p3549_p13 }
  0x4c   : > { %3559 = shalt.err (!%p3556_p0)
}
  0x4d   : > { %s4197_s15 = smov 4   ;;  %s4198_s28 = smov 64  }
  0x4e   : > { %3314 = dma.hbm_to_vmem [thread:$0]  (!%p3845_p2), %s219_s4, 2048, %s221_s26, %s208_s13, %s4198_s28, %s4198_s28, %s4197_s15  }
  0x4f   : > { %232 = sbr.rel (%p3773_p8) target bundleno = 495 (0x1ef), region = 32  ;;  %s3859_s7 = sand.u32 (!%p3773_p8), 1, %s3640_s16  }
  0x50   : > { %s2231_s6 = sshll.u32 (!%p3773_p8), %s3859_s7, 7  ;;  %s235_s14 = scalar_lea.sflag (!%p3773_p8), [#allocation3], %s3859_s7 }
  0x51   : > { %s3865_s23 = scalar_lea.vmem (!%p3773_p8), [#allocation2], %s2231_s6 }
  0x54   : > { %3619 = dma.done.wait (%p3763_p4), %s235_s14, 2048  }
  0x55   : > { %3621 = vsyncadd (%p3763_p4), %s235_s14, 4294965248 }
  0x56   : > { %3623 = dma.done.wait (%p3753_p1), [#allocation6], 5120  }
  0x57   : > { %3625 = vsyncadd (%p3753_p1), [#allocation6], 4294962176  ;;  %v3408_v0 = vld [vmem:[#allocation5 + $0x38] sm:$0xff]   ;;  %v3409_v1 = vld [vmem:[#allocation5 + $0x30] sm:$0xff]   ;;  %v3673_v56 = vmov 0   ;;  %s3995_s3 = scalar_lea.vmem [#allocation8], %s2231_s6 }
  0x58   : > { %3220 = vmatprep.subr.bf16.mxu0 %v3408_v0  ;;  %3268 = vmatprep.subr.bf16.mxu1 %v3408_v0  ;;  %v3410_v2 = vld [vmem:[#allocation5 + $0x28] sm:$0xff]   ;;  %v3411_v3 = vld [vmem:[#allocation5 + $0x20] sm:$0xff]   ;;  %v3412_v6 = vld [vmem:[#allocation5 + $0x18] sm:$0xff]   ;;  %s2550_s4 = sshll.u32 %s3648_s18, 5  ;;  %s2551_s25 = sshll.u32 %s3652_s19, 6 }
  0x59   : > { %3221 = vmatpush3.bf16.msra.mxu0 %v3408_v0  ;;  %3276 = vmatpush3.bf16.msra.mxu1 %v3408_v0  ;;  %v3876_v4 = vld [vmem:[%s3865_s23] sm:$0xff]   ;;  %v3413_v7 = vld [vmem:[#allocation5 + $0x10] sm:$0xff]   ;;  %v3414_v8 = vld [vmem:[#allocation5 + $0x8] sm:$0xff]   ;;  %s2235_s27 = sshll.u32 %s3859_s7, 9  ;;  %s2032_s29 = sadd.s32 %s2551_s25, %s2550_s4 }
  0x5a   : > { %3222 = vmatprep.subr.bf16.mxu0 %v3409_v1  ;;  %3269 = vmatprep.subr.bf16.mxu1 %v3409_v1  ;;  %v3879_v5 = vld [vmem:[%s3865_s23 + $0x40] sm:$0xff]   ;;  %v3884_v11 = vld [vmem:[%s3865_s23 + $0x8] sm:$0xff]   ;;  %v3890_v18 = vld [vmem:[%s3865_s23 + $0x10] sm:$0xff]   ;;  %s2552_s24 = sshll.u32 %s2032_s29, 6  ;;  %s2035_s30 = sshll.u32 %s3995_s3, 4  ;;  %s4024_s30 = int_to_ptr.vmem [resolvable:$true] %s2035_s30 }
  0x5b   : > { %3236 = vmatprep.mubr.bf16.mxu0 %v3876_v4  ;;  %3252 = vmatprep.mubr.bf16.mxu1 %v3879_v5  ;;  %v3415_v9 = vld [vmem:[#allocation5] sm:$0xff]   ;;  %v3887_v12 = vld [vmem:[%s3865_s23 + $0x48] sm:$0xff]   ;;  %v3893_v19 = vld [vmem:[%s3865_s23 + $0x50] sm:$0xff]   ;;  %s4199_s13 = sld [smem:[#allocation22_spill]]  ;;  %s2015_s1 = scalar_lea.sflag [#allocation4], %s3859_s7 }
  0x5c   : > { %v3422_v10 = vld [vmem:[#allocation7 + $0xe4] ss:$16 sps:$4 sm:$0xff]   ;;  %v3425_v13 = vld [vmem:[#allocation7 + $0xec] ss:$16 sps:$4 sm:$0xff]   ;;  %v3420_v14 = vld [vmem:[#allocation7 + $0xe0] ss:$16 sps:$4 sm:$0xff]  }
  0x5d   : > { %3223 = vmatpush3.bf16.msra.mxu0 %v3409_v1  ;;  %3277 = vmatpush3.bf16.msra.mxu1 %v3409_v1  ;;  %v3423_v15 = vld [vmem:[#allocation7 + $0xe8] ss:$16 sps:$4 sm:$0xff]   ;;  %v3428_v16 = vld [vmem:[#allocation7 + $0xc4] ss:$16 sps:$4 sm:$0xff]   ;;  %v3431_v17 = vld [vmem:[#allocation7 + $0xcc] ss:$16 sps:$4 sm:$0xff]  }
  0x5e   : > { %3224 = vmatprep.subr.bf16.mxu0 %v3410_v2  ;;  %3270 = vmatprep.subr.bf16.mxu1 %v3410_v2  ;;  %v3426_v20 = vld [vmem:[#allocation7 + $0xc0] ss:$16 sps:$4 sm:$0xff]   ;;  %v3429_v21 = vld [vmem:[#allocation7 + $0xc8] ss:$16 sps:$4 sm:$0xff]   ;;  %v3438_v22 = vld [vmem:[#allocation7 + $0xa4] ss:$16 sps:$4 sm:$0xff]  }
  0x5f   : > { %v3898_v23 = vld [vmem:[%s3865_s23 + $0x18] sm:$0xff]   ;;  %v3436_v26 = vld [vmem:[#allocation7 + $0xa0] ss:$16 sps:$4 sm:$0xff]   ;;  %v3444_v28 = vld [vmem:[#allocation7 + $0x84] ss:$16 sps:$4 sm:$0xff]   ;;  %s3560_s11 = scalar_lea.vmem %s4024_s30, 2048 }
  0x60   : > { %v3901_v24 = vld [vmem:[%s3865_s23 + $0x58] sm:$0xff]   ;;  %v3906_v30 = vld [vmem:[%s3865_s23 + $0x20] sm:$0xff]   ;;  %v3916_v36 = vld [vmem:[%s3865_s23 + $0x28] sm:$0xff]   ;;  %p3561_p1 = scmp.ne.s32.totalorder %s4024_s30, %s3560_s11  ;;  %p4200_p4 = scmp.ne.s32.totalorder %s4195_s8, 0 }
  0x61   : > { %3225 = vmatpush3.bf16.msra.mxu0 %v3410_v2  ;;  %3278 = vmatpush3.bf16.msra.mxu1 %v3410_v2  ;;  %v3441_v25 = vld [vmem:[#allocation7 + $0xac] ss:$16 sps:$4 sm:$0xff]   ;;  %v3439_v27 = vld [vmem:[#allocation7 + $0xa8] ss:$16 sps:$4 sm:$0xff]   ;;  %v3909_v31 = vld [vmem:[%s3865_s23 + $0x60] sm:$0xff]   ;;  %s4020_s10 = scalar_lea.hbm %s4199_s13, %s2552_s24  ;;  %s3674_s12 = smov [#allocation8]  }
  0x62   : > { %3226 = vmatprep.subr.bf16.mxu0 %v3411_v3  ;;  %3271 = vmatprep.subr.bf16.mxu1 %v3411_v3  ;;  %v3447_v29 = vld [vmem:[#allocation7 + $0x8c] ss:$16 sps:$4 sm:$0xff]   ;;  %v3442_v32 = vld [vmem:[#allocation7 + $0x80] ss:$16 sps:$4 sm:$0xff]   ;;  %v3445_v33 = vld [vmem:[#allocation7 + $0x88] ss:$16 sps:$4 sm:$0xff]   ;;  %p3562_p6 = pnand %p3561_p1, %p4200_p4 }
  0x63   : > { %v3454_v34 = vld [vmem:[#allocation7 + $0x64] ss:$16 sps:$4 sm:$0xff]   ;;  %v3457_v35 = vld [vmem:[#allocation7 + $0x6c] ss:$16 sps:$4 sm:$0xff]   ;;  %v3452_v38 = vld [vmem:[#allocation7 + $0x60] ss:$16 sps:$4 sm:$0xff]  }
  0x64   : > { %v3919_v37 = vld [vmem:[%s3865_s23 + $0x68] sm:$0xff]   ;;  %v3460_v40 = vld [vmem:[#allocation7 + $0x44] ss:$16 sps:$4 sm:$0xff]   ;;  %v3458_v44 = vld [vmem:[#allocation7 + $0x40] ss:$16 sps:$4 sm:$0xff]   ;;  %p3563_p8 = pneg %p3562_p6  ;;  %s3564_s15 = sshll.u32 %s3674_s12, 4  ;;  %s3565_s15 = int_to_ptr.vmem [resolvable:$false] %s3564_s15 }
  0x65   : > { %3227 = vmatpush3.bf16.msra.mxu0 %v3411_v3  ;;  %3279 = vmatpush3.bf16.msra.mxu1 %v3411_v3  ;;  %v3455_v39 = vld [vmem:[#allocation7 + $0x68] ss:$16 sps:$4 sm:$0xff]   ;;  %v3463_v41 = vld [vmem:[#allocation7 + $0x4c] ss:$16 sps:$4 sm:$0xff]   ;;  %v3464_v42 = vld [vmem:[%s3865_s23 + $0x30] sm:$0xff]   ;;  %s3566_s28 = scalar_lea.vmem %s3565_s15, 4096  ;;  %p3567_p3 = scmp.lt.s32.totalorder %s4024_s30, %s3565_s15 }
  0x66   : > { %3228 = vmatprep.subr.bf16.mxu0 %v3412_v6  ;;  %3272 = vmatprep.subr.bf16.mxu1 %v3412_v6  ;;  %v3923_v43 = vld [vmem:[%s3865_s23 + $0x70] sm:$0xff]   ;;  %v3461_v45 = vld [vmem:[#allocation7 + $0x48] ss:$16 sps:$4 sm:$0xff]   ;;  %v3473_v47 = vld [vmem:[#allocation7 + $0x2c] ss:$16 sps:$4 sm:$0xff]   ;;  %p3568_p0 = scmp.lt.s32.totalorder %s3566_s28, %s3560_s11 }
  0x67   : > { %v3470_v46 = vld [vmem:[#allocation7 + $0x24] ss:$16 sps:$4 sm:$0xff]   ;;  %v3466_v48 = vld [vmem:[%s3865_s23 + $0x38] sm:$0xff]   ;;  %v3468_v50 = vld [vmem:[#allocation7 + $0x20] ss:$16 sps:$4 sm:$0xff]  }
  0x68   : > { %v3930_v49 = vld [vmem:[%s3865_s23 + $0x78] sm:$0xff]   ;;  %v3476_v52 = vld [vmem:[#allocation7 + $0x4] ss:$16 sps:$4 sm:$0xff]   ;;  %v3474_v54 = vld [vmem:[#allocation7] ss:$16 sps:$4 sm:$0xff]   ;;  %p3569_p5 = por %p3568_p0, %p3567_p3 }
  0x69   : > { %3229 = vmatpush3.bf16.msra.mxu0 %v3412_v6  ;;  %3280 = vmatpush3.bf16.msra.mxu1 %v3412_v6  ;;  %v3471_v51 = vld [vmem:[#allocation7 + $0x28] ss:$16 sps:$4 sm:$0xff]   ;;  %v3479_v53 = vld [vmem:[#allocation7 + $0xc] ss:$16 sps:$4 sm:$0xff]  }
  0x6a   : > { %3230 = vmatprep.subr.bf16.mxu0 %v3413_v7  ;;  %3273 = vmatprep.subr.bf16.mxu1 %v3413_v7  ;;  %v3477_v55 = vld [vmem:[#allocation7 + $0x8] ss:$16 sps:$4 sm:$0xff]   ;;  %p3570_p2 = pnand %p3569_p5, %p3563_p8 }
  0x6d   : > { %3231 = vmatpush3.bf16.msra.mxu0 %v3413_v7  ;;  %3281 = vmatpush3.bf16.msra.mxu1 %v3413_v7 }
  0x6e   : > { %3232 = vmatprep.subr.bf16.mxu0 %v3414_v8  ;;  %3274 = vmatprep.subr.bf16.mxu1 %v3414_v8 }
  0x71   : > { %3233 = vmatpush3.bf16.msra.mxu0 %v3414_v8  ;;  %3282 = vmatpush3.bf16.msra.mxu1 %v3414_v8 }
  0x72   : > { %3234 = vmatprep.subr.bf16.mxu0 %v3415_v9  ;;  %3275 = vmatprep.subr.bf16.mxu1 %v3415_v9 }
  0x75   : > { %3235 = vmatpush3.bf16.msra.mxu0 %v3415_v9  ;;  %3283 = vmatpush3.bf16.msra.mxu1 %v3415_v9 }
  0x76   : > { %985 = vmatprep.subr.bf16.mxu1 %v3422_v10  ;;  %1178 = vmatprep.subr.bf16.mxu0 %v3425_v13 }
  0x78   : > { %3237 = vmatmul.mubr.bf16.vlgmr.msra.gmra.mxu0 %v3884_v11  ;;  %3253 = vmatmul.mubr.bf16.vlgmr.msra.gmra.mxu1 %v3887_v12 }
  0x79   : > { %986 = vmatpush1.bf16.msra.mxu1 %v3420_v14  ;;  %1179 = vmatpush1.bf16.msra.mxu0 %v3423_v15 }
  0x7a   : > { %987 = vmatprep.subr.bf16.mxu1 %v3428_v16  ;;  %1180 = vmatprep.subr.bf16.mxu0 %v3431_v17 }
  0x7b   : > { %3240 = vmatprep.mubr.bf16.mxu0 %v3890_v18  ;;  %3256 = vmatprep.mubr.bf16.mxu1 %v3893_v19 }
  0x7d   : > { %988 = vmatpush1.bf16.msra.mxu1 %v3426_v20  ;;  %1181 = vmatpush1.bf16.msra.mxu0 %v3429_v21 }
  0x7e   : > { %989 = vmatprep.subr.bf16.mxu1 %v3438_v22  ;;  %1182 = vmatprep.subr.bf16.mxu0 %v3441_v25 }
  0x80   : > { %3241 = vmatmul.mubr.bf16.gmra.mxu0 %v3898_v23  ;;  %3257 = vmatmul.mubr.bf16.gmra.mxu1 %v3901_v24 }
  0x81   : > { %990 = vmatpush1.bf16.msra.mxu1 %v3436_v26  ;;  %1183 = vmatpush1.bf16.msra.mxu0 %v3439_v27 }
  0x82   : > { %991 = vmatprep.subr.bf16.mxu1 %v3444_v28  ;;  %1184 = vmatprep.subr.bf16.mxu0 %v3447_v29 }
  0x83   : > { %3244 = vmatprep.mubr.bf16.mxu0 %v3906_v30  ;;  %3260 = vmatprep.mubr.bf16.mxu1 %v3909_v31 }
  0x85   : > { %992 = vmatpush1.bf16.msra.mxu1 %v3442_v32  ;;  %1185 = vmatpush1.bf16.msra.mxu0 %v3445_v33 }
  0x86   : > { %993 = vmatprep.subr.bf16.mxu1 %v3454_v34  ;;  %1186 = vmatprep.subr.bf16.mxu0 %v3457_v35 }
  0x88   : > { %3245 = vmatmul.mubr.bf16.gmra.mxu0 %v3916_v36  ;;  %3261 = vmatmul.mubr.bf16.gmra.mxu1 %v3919_v37 }
  0x89   : > { %994 = vmatpush1.bf16.msra.mxu1 %v3452_v38  ;;  %1187 = vmatpush1.bf16.msra.mxu0 %v3455_v39 }
  0x8a   : > { %995 = vmatprep.subr.bf16.mxu1 %v3460_v40  ;;  %1188 = vmatprep.subr.bf16.mxu0 %v3463_v41 }
  0x8b   : > { %3248 = vmatprep.mubr.bf16.mxu0 %v3464_v42  ;;  %3264 = vmatprep.mubr.bf16.mxu1 %v3923_v43 }
  0x8d   : > { %996 = vmatpush1.bf16.msra.mxu1 %v3458_v44  ;;  %1189 = vmatpush1.bf16.msra.mxu0 %v3461_v45 }
  0x8e   : > { %997 = vmatprep.subr.bf16.mxu1 %v3470_v46  ;;  %1190 = vmatprep.subr.bf16.mxu0 %v3473_v47 }
  0x90   : > { %3249 = vmatmul.mubr.bf16.gmra.mxu0 %v3466_v48  ;;  %3265 = vmatmul.mubr.bf16.gmra.mxu1 %v3930_v49 }
  0x91   : > { %998 = vmatpush1.bf16.msra.mxu1 %v3468_v50  ;;  %1191 = vmatpush1.bf16.msra.mxu0 %v3471_v51 }
  0x92   : > { %999 = vmatprep.subr.bf16.mxu1 %v3476_v52  ;;  %1192 = vmatprep.subr.bf16.mxu0 %v3479_v53 }
  0x93   : > { %1017 = vmatprep.mubr.bf16.mxu1 %v3673_v56  ;;  %1210 = vmatprep.mubr.bf16.mxu0 %v3673_v56 }
  0x95   : > { %1000 = vmatpush1.bf16.msra.mxu1 %v3474_v54  ;;  %1193 = vmatpush1.bf16.msra.mxu0 %v3477_v55 }
  0x98   : > { %1018 = vmatmul.mubr.bf16.vlgmr.msra.gmra.mxu1 %v3876_v4  ;;  %1211 = vmatmul.mubr.bf16.vlgmr.msra.gmra.mxu0 %v3876_v4 }
  0x99   : > { %1027 = vmatprep.mubr.bf16.mxu1 %v3673_v56  ;;  %1220 = vmatprep.mubr.bf16.mxu0 %v3673_v56 }
  0xa0   : > { %1028 = vmatmul.mubr.bf16.gmra.mxu1 %v3884_v11  ;;  %1221 = vmatmul.mubr.bf16.gmra.mxu0 %v3884_v11 }
  0xa1   : > { %1037 = vmatprep.mubr.bf16.mxu1 %v3673_v56  ;;  %1230 = vmatprep.mubr.bf16.mxu0 %v3673_v56 }
  0xa8   : > { %1038 = vmatmul.mubr.bf16.gmra.mxu1 %v3890_v18  ;;  %1231 = vmatmul.mubr.bf16.gmra.mxu0 %v3890_v18 }
  0xa9   : > { %1047 = vmatprep.mubr.bf16.mxu1 %v3673_v56  ;;  %1240 = vmatprep.mubr.bf16.mxu0 %v3673_v56 }
  0xb0   : > { %1048 = vmatmul.mubr.bf16.gmra.mxu1 %v3898_v23  ;;  %1241 = vmatmul.mubr.bf16.gmra.mxu0 %v3898_v23 }
  0xb1   : > { %1057 = vmatprep.mubr.bf16.mxu1 %v3673_v56  ;;  %1250 = vmatprep.mubr.bf16.mxu0 %v3673_v56 }
  0xb8   : > { %1058 = vmatmul.mubr.bf16.gmra.mxu1 %v3906_v30  ;;  %1251 = vmatmul.mubr.bf16.gmra.mxu0 %v3906_v30 }
  0xb9   : > { %1067 = vmatprep.mubr.bf16.mxu1 %v3673_v56  ;;  %1260 = vmatprep.mubr.bf16.mxu0 %v3673_v56 }
  0xc0   : > { %1068 = vmatmul.mubr.bf16.gmra.mxu1 %v3916_v36  ;;  %1261 = vmatmul.mubr.bf16.gmra.mxu0 %v3916_v36 }
  0xc1   : > { %1077 = vmatprep.mubr.bf16.mxu1 %v3673_v56  ;;  %1270 = vmatprep.mubr.bf16.mxu0 %v3673_v56 }
  0xc8   : > { %1078 = vmatmul.mubr.bf16.gmra.mxu1 %v3464_v42  ;;  %1271 = vmatmul.mubr.bf16.gmra.mxu0 %v3464_v42 }
  0xc9   : > { %1087 = vmatprep.mubr.bf16.mxu1 %v3673_v56  ;;  %1280 = vmatprep.mubr.bf16.mxu0 %v3673_v56 }
  0xd0   : > { %1088 = vmatmul.mubr.bf16.gmra.mxu1 %v3466_v48  ;;  %1281 = vmatmul.mubr.bf16.gmra.mxu0 %v3466_v48 }
  0xd1   : > { %1097 = vmatprep.mubr.bf16.mxu1 %v3673_v56  ;;  %1290 = vmatprep.mubr.bf16.mxu0 %v3673_v56 }
  0xd8   : > { %1098 = vmatmul.mubr.bf16.gmra.mxu1 %v3879_v5  ;;  %1291 = vmatmul.mubr.bf16.gmra.mxu0 %v3879_v5 }
  0xd9   : > { %1107 = vmatprep.mubr.bf16.mxu1 %v3673_v56  ;;  %1300 = vmatprep.mubr.bf16.mxu0 %v3673_v56 }
  0xe0   : > { %1108 = vmatmul.mubr.bf16.gmra.mxu1 %v3887_v12  ;;  %1301 = vmatmul.mubr.bf16.gmra.mxu0 %v3887_v12 }
  0xe1   : > { %1117 = vmatprep.mubr.bf16.mxu1 %v3673_v56  ;;  %1310 = vmatprep.mubr.bf16.mxu0 %v3673_v56 }
  0xe8   : > { %1118 = vmatmul.mubr.bf16.gmra.mxu1 %v3893_v19  ;;  %1311 = vmatmul.mubr.bf16.gmra.mxu0 %v3893_v19 }
  0xe9   : > { %1127 = vmatprep.mubr.bf16.mxu1 %v3673_v56  ;;  %1320 = vmatprep.mubr.bf16.mxu0 %v3673_v56 }
  0xf0   : > { %1128 = vmatmul.mubr.bf16.gmra.mxu1 %v3901_v24  ;;  %1321 = vmatmul.mubr.bf16.gmra.mxu0 %v3901_v24 }
  0xf1   : > { %1137 = vmatprep.mubr.bf16.mxu1 %v3673_v56  ;;  %1330 = vmatprep.mubr.bf16.mxu0 %v3673_v56 }
  0xf8   : > { %1138 = vmatmul.mubr.bf16.gmra.mxu1 %v3909_v31  ;;  %1331 = vmatmul.mubr.bf16.gmra.mxu0 %v3909_v31 }
  0xf9   : > { %1147 = vmatprep.mubr.bf16.mxu1 %v3673_v56  ;;  %1340 = vmatprep.mubr.bf16.mxu0 %v3673_v56 }
 0x100   : > { %1148 = vmatmul.mubr.bf16.gmra.mxu1 %v3919_v37  ;;  %1341 = vmatmul.mubr.bf16.gmra.mxu0 %v3919_v37 }
 0x101   : > { %1157 = vmatprep.mubr.bf16.mxu1 %v3673_v56  ;;  %1350 = vmatprep.mubr.bf16.mxu0 %v3673_v56 }
 0x108   : > { %1158 = vmatmul.mubr.bf16.gmra.mxu1 %v3923_v43  ;;  %1351 = vmatmul.mubr.bf16.gmra.mxu0 %v3923_v43 }
 0x109   : > { %1167 = vmatprep.mubr.bf16.mxu1 %v3673_v56  ;;  %1360 = vmatprep.mubr.bf16.mxu0 %v3673_v56 }
 0x110   : > { %1168 = vmatmul.mubr.bf16.gmra.mxu1 %v3930_v49  ;;  %1361 = vmatmul.mubr.bf16.gmra.mxu0 %v3930_v49 }
 0x138   : > { %v3238_v57 = vpop.f32.mrf.mxu0  ;;  %v3254_v58 = vpop.f32.mrf.mxu1 }
 0x13a   : > { %v506_v59 = vpop.f32.mrf.mxu0  ;;  %v570_v60 = vpop.f32.mrf.mxu1 }
 0x13c   : > { %v3239_v61 = vpop.f32.mrf.mxu0  ;;  %v3255_v62 = vpop.f32.mrf.mxu1 }
 0x13d   : > { %v2726_v63 = vpack.c.bf16 %v3239_v61, %v3238_v57  ;;  %v2766_v0 = vpack.c.bf16 %v3255_v62, %v3254_v58 }
 0x13e   : > { %v509_v1 = vpop.f32.mrf.mxu0  ;;  %v573_v2 = vpop.f32.mrf.mxu1 }
 0x13f   : > { %3118 = vst [vmem:[%s3995_s3 + $0x8] sm:$0xff] %v2726_v63   ;;  %3126 = vst [vmem:[%s3995_s3 + $0x48] sm:$0xff] %v2766_v0   ;;  %v2721_v3 = vpack.c.bf16 %v509_v1, %v506_v59  ;;  %v2761_v4 = vpack.c.bf16 %v573_v2, %v570_v60 }
 0x140   : > { %v3242_v5 = vpop.f32.mrf.mxu0  ;;  %v3258_v6 = vpop.f32.mrf.mxu1 }
 0x141   : > { %2722 = vst [vmem:[%s3995_s3] sm:$0xff] %v2721_v3   ;;  %3125 = vst [vmem:[%s3995_s3 + $0x40] sm:$0xff] %v2761_v4  }
 0x142   : > { %v522_v7 = vpop.f32.mrf.mxu0  ;;  %v586_v8 = vpop.f32.mrf.mxu1 }
 0x144   : > { %v3243_v9 = vpop.f32.mrf.mxu0  ;;  %v3259_v10 = vpop.f32.mrf.mxu1 }
 0x145   : > { %v2736_v11 = vpack.c.bf16 %v3243_v9, %v3242_v5  ;;  %v2776_v12 = vpack.c.bf16 %v3259_v10, %v3258_v6 }
 0x146   : > { %v525_v13 = vpop.f32.mrf.mxu0  ;;  %v589_v14 = vpop.f32.mrf.mxu1 }
 0x147   : > { %3120 = vst [vmem:[%s3995_s3 + $0x18] sm:$0xff] %v2736_v11   ;;  %3128 = vst [vmem:[%s3995_s3 + $0x58] sm:$0xff] %v2776_v12   ;;  %v2731_v15 = vpack.c.bf16 %v525_v13, %v522_v7  ;;  %v2771_v16 = vpack.c.bf16 %v589_v14, %v586_v8 }
 0x148   : > { %v3246_v17 = vpop.f32.mrf.mxu0  ;;  %v3262_v18 = vpop.f32.mrf.mxu1 }
 0x149   : > { %3119 = vst [vmem:[%s3995_s3 + $0x10] sm:$0xff] %v2731_v15   ;;  %3127 = vst [vmem:[%s3995_s3 + $0x50] sm:$0xff] %v2771_v16  }
 0x14a   : > { %v538_v19 = vpop.f32.mrf.mxu0  ;;  %v602_v20 = vpop.f32.mrf.mxu1 }
 0x14c   : > { %v3247_v21 = vpop.f32.mrf.mxu0  ;;  %v3263_v22 = vpop.f32.mrf.mxu1 }
 0x14d   : > { %v2746_v23 = vpack.c.bf16 %v3247_v21, %v3246_v17  ;;  %v2786_v24 = vpack.c.bf16 %v3263_v22, %v3262_v18 }
 0x14e   : > { %v541_v25 = vpop.f32.mrf.mxu0  ;;  %v605_v26 = vpop.f32.mrf.mxu1 }
 0x14f   : > { %3122 = vst [vmem:[%s3995_s3 + $0x28] sm:$0xff] %v2746_v23   ;;  %3130 = vst [vmem:[%s3995_s3 + $0x68] sm:$0xff] %v2786_v24   ;;  %v2741_v27 = vpack.c.bf16 %v541_v25, %v538_v19  ;;  %v2781_v28 = vpack.c.bf16 %v605_v26, %v602_v20 }
 0x150   : > { %v3250_v29 = vpop.f32.mrf.mxu0  ;;  %v3266_v30 = vpop.f32.mrf.mxu1 }
 0x151   : > { %3121 = vst [vmem:[%s3995_s3 + $0x20] sm:$0xff] %v2741_v27   ;;  %3129 = vst [vmem:[%s3995_s3 + $0x60] sm:$0xff] %v2781_v28  }
 0x152   : > { %v554_v31 = vpop.f32.mrf.mxu0  ;;  %v618_v32 = vpop.f32.mrf.mxu1 }
 0x154   : > { %v3251_v33 = vpop.f32.mrf.mxu0  ;;  %v3267_v34 = vpop.f32.mrf.mxu1 }
 0x155   : > { %v2756_v35 = vpack.c.bf16 %v3251_v33, %v3250_v29  ;;  %v2796_v36 = vpack.c.bf16 %v3267_v34, %v3266_v30 }
 0x156   : > { %v557_v37 = vpop.f32.mrf.mxu0  ;;  %v621_v38 = vpop.f32.mrf.mxu1 }
 0x157   : > { %3124 = vst [vmem:[%s3995_s3 + $0x38] sm:$0xff] %v2756_v35   ;;  %3132 = vst [vmem:[%s3995_s3 + $0x78] sm:$0xff] %v2796_v36   ;;  %v2751_v39 = vpack.c.bf16 %v557_v37, %v554_v31  ;;  %v2791_v40 = vpack.c.bf16 %v621_v38, %v618_v32 }
 0x158   : > { %v1019_v41 = vpop.f32.mrf.mxu1  ;;  %v1212_v42 = vpop.f32.mrf.mxu0 }
 0x159   : > { %3123 = vst [vmem:[%s3995_s3 + $0x30] sm:$0xff] %v2751_v39   ;;  %3131 = vst [vmem:[%s3995_s3 + $0x70] sm:$0xff] %v2791_v40  }
 0x15a   : > { %v1021_v43 = vpop.f32.mrf.mxu1  ;;  %v1214_v44 = vpop.f32.mrf.mxu0 }
 0x15b   : > { %3573 = shalt.err (!%p3570_p2)
}
 0x15c   : > { %s3574_s6 = scalar_lea.hbm %s4020_s10, 2048  ;;  %s3578_s3 = scalar_lea.hbm %s4199_s13, 8192 }
 0x15d   : > { %p3575_p9 = scmp.ne.s32.totalorder %s4020_s10, %s3574_s6  ;;  %p3579_p13 = scmp.lt.s32.totalorder %s4020_s10, %s4199_s13 }
 0x15e   : > { %p3580_p10 = scmp.lt.s32.totalorder %s3578_s3, %s3574_s6 }
 0x15f   : > { %p3576_p11 = pnand %p3575_p9, %p4200_p4 }
 0x160   : > { %p3581_p7 = por %p3580_p10, %p3579_p13 }
 0x161   : > { %p3577_p12 = pneg %p3576_p11 }
 0x163   : > { %p3582_p1 = pnand %p3581_p7, %p3577_p12 }
 0x165   : > { %3585 = shalt.err (!%p3582_p1)
}
 0x166   : > { %s3675_s24 = smov 64   ;;  %s3676_s5 = smov 4   ;;  %v1023_v45 = vpop.f32.mrf.mxu1  ;;  %v1216_v46 = vpop.f32.mrf.mxu0 }
 0x167   : > { %3294 = dma.vmem_to_hbm [thread:$0]  (%p4200_p4), %s4024_s30, 2048, %s4020_s10, %s2015_s1, %s3675_s24, %s3675_s24, %s3676_s5   ;;  %v2801_v47 = vpack.c.bf16 %v1023_v45, %v1019_v41  ;;  %v2961_v48 = vpack.c.bf16 %v1216_v46, %v1212_v42 }
 0x168   : > { %v1025_v49 = vpop.f32.mrf.mxu1  ;;  %v1218_v50 = vpop.f32.mrf.mxu0  ;;  %s4051_s26 = scalar_lea.vmem [#allocation9], %s2235_s27  ;;  %s2020_s27 = scalar_lea.sflag [#allocation10], %s3859_s7 }
 0x169   : > { %2802 = vst [vmem:[%s4051_s26] sm:$0xff] %v2801_v47   ;;  %3164 = vst [vmem:[%s4051_s26 + $0x100] sm:$0xff] %v2961_v48   ;;  %v2881_v51 = vpack.c.bf16 %v1025_v49, %v1021_v43  ;;  %v3041_v52 = vpack.c.bf16 %v1218_v50, %v1214_v44 }
 0x16a   : > { %v1029_v53 = vpop.f32.mrf.mxu1  ;;  %v1222_v54 = vpop.f32.mrf.mxu0 }
 0x16b   : > { %3148 = vst [vmem:[%s4051_s26 + $0x80] sm:$0xff] %v2881_v51   ;;  %3180 = vst [vmem:[%s4051_s26 + $0x180] sm:$0xff] %v3041_v52  }
 0x16c   : > { %v1031_v55 = vpop.f32.mrf.mxu1  ;;  %v1224_v56 = vpop.f32.mrf.mxu0 }
 0x16e   : > { %v1033_v57 = vpop.f32.mrf.mxu1  ;;  %v1226_v58 = vpop.f32.mrf.mxu0 }
 0x16f   : > { %v2806_v59 = vpack.c.bf16 %v1033_v57, %v1029_v53  ;;  %v2966_v60 = vpack.c.bf16 %v1226_v58, %v1222_v54 }
 0x170   : > { %v1035_v61 = vpop.f32.mrf.mxu1  ;;  %v1228_v62 = vpop.f32.mrf.mxu0 }
 0x171   : > { %3133 = vst [vmem:[%s4051_s26 + $0x8] sm:$0xff] %v2806_v59   ;;  %3165 = vst [vmem:[%s4051_s26 + $0x108] sm:$0xff] %v2966_v60   ;;  %v2886_v63 = vpack.c.bf16 %v1035_v61, %v1031_v55  ;;  %v3046_v0 = vpack.c.bf16 %v1228_v62, %v1224_v56 }
 0x172   : > { %v1039_v1 = vpop.f32.mrf.mxu1  ;;  %v1232_v2 = vpop.f32.mrf.mxu0 }
 0x173   : > { %3149 = vst [vmem:[%s4051_s26 + $0x88] sm:$0xff] %v2886_v63   ;;  %3181 = vst [vmem:[%s4051_s26 + $0x188] sm:$0xff] %v3046_v0  }
 0x174   : > { %v1041_v3 = vpop.f32.mrf.mxu1  ;;  %v1234_v4 = vpop.f32.mrf.mxu0 }
 0x176   : > { %v1043_v5 = vpop.f32.mrf.mxu1  ;;  %v1236_v6 = vpop.f32.mrf.mxu0 }
 0x177   : > { %v2811_v7 = vpack.c.bf16 %v1043_v5, %v1039_v1  ;;  %v2971_v8 = vpack.c.bf16 %v1236_v6, %v1232_v2 }
 0x178   : > { %v1045_v9 = vpop.f32.mrf.mxu1  ;;  %v1238_v10 = vpop.f32.mrf.mxu0 }
 0x179   : > { %3134 = vst [vmem:[%s4051_s26 + $0x10] sm:$0xff] %v2811_v7   ;;  %3166 = vst [vmem:[%s4051_s26 + $0x110] sm:$0xff] %v2971_v8   ;;  %v2891_v11 = vpack.c.bf16 %v1045_v9, %v1041_v3  ;;  %v3051_v12 = vpack.c.bf16 %v1238_v10, %v1234_v4 }
 0x17a   : > { %v1049_v13 = vpop.f32.mrf.mxu1  ;;  %v1242_v14 = vpop.f32.mrf.mxu0 }
 0x17b   : > { %3150 = vst [vmem:[%s4051_s26 + $0x90] sm:$0xff] %v2891_v11   ;;  %3182 = vst [vmem:[%s4051_s26 + $0x190] sm:$0xff] %v3051_v12  }
 0x17c   : > { %v1051_v15 = vpop.f32.mrf.mxu1  ;;  %v1244_v16 = vpop.f32.mrf.mxu0 }
 0x17e   : > { %v1053_v17 = vpop.f32.mrf.mxu1  ;;  %v1246_v18 = vpop.f32.mrf.mxu0 }
 0x17f   : > { %v2816_v19 = vpack.c.bf16 %v1053_v17, %v1049_v13  ;;  %v2976_v20 = vpack.c.bf16 %v1246_v18, %v1242_v14 }
 0x180   : > { %v1055_v21 = vpop.f32.mrf.mxu1  ;;  %v1248_v22 = vpop.f32.mrf.mxu0 }
 0x181   : > { %3135 = vst [vmem:[%s4051_s26 + $0x18] sm:$0xff] %v2816_v19   ;;  %3167 = vst [vmem:[%s4051_s26 + $0x118] sm:$0xff] %v2976_v20   ;;  %v2896_v23 = vpack.c.bf16 %v1055_v21, %v1051_v15  ;;  %v3056_v24 = vpack.c.bf16 %v1248_v22, %v1244_v16 }
 0x182   : > { %v1059_v25 = vpop.f32.mrf.mxu1  ;;  %v1252_v26 = vpop.f32.mrf.mxu0 }
 0x183   : > { %3151 = vst [vmem:[%s4051_s26 + $0x98] sm:$0xff] %v2896_v23   ;;  %3183 = vst [vmem:[%s4051_s26 + $0x198] sm:$0xff] %v3056_v24  }
 0x184   : > { %v1061_v27 = vpop.f32.mrf.mxu1  ;;  %v1254_v28 = vpop.f32.mrf.mxu0 }
 0x186   : > { %v1063_v29 = vpop.f32.mrf.mxu1  ;;  %v1256_v30 = vpop.f32.mrf.mxu0 }
 0x187   : > { %v2821_v31 = vpack.c.bf16 %v1063_v29, %v1059_v25  ;;  %v2981_v32 = vpack.c.bf16 %v1256_v30, %v1252_v26 }
 0x188   : > { %v1065_v33 = vpop.f32.mrf.mxu1  ;;  %v1258_v34 = vpop.f32.mrf.mxu0 }
 0x189   : > { %3136 = vst [vmem:[%s4051_s26 + $0x20] sm:$0xff] %v2821_v31   ;;  %3168 = vst [vmem:[%s4051_s26 + $0x120] sm:$0xff] %v2981_v32   ;;  %v2901_v35 = vpack.c.bf16 %v1065_v33, %v1061_v27  ;;  %v3061_v36 = vpack.c.bf16 %v1258_v34, %v1254_v28 }
 0x18a   : > { %v1069_v37 = vpop.f32.mrf.mxu1  ;;  %v1262_v38 = vpop.f32.mrf.mxu0 }
 0x18b   : > { %3152 = vst [vmem:[%s4051_s26 + $0xa0] sm:$0xff] %v2901_v35   ;;  %3184 = vst [vmem:[%s4051_s26 + $0x1a0] sm:$0xff] %v3061_v36  }
 0x18c   : > { %v1071_v39 = vpop.f32.mrf.mxu1  ;;  %v1264_v40 = vpop.f32.mrf.mxu0 }
 0x18e   : > { %v1073_v41 = vpop.f32.mrf.mxu1  ;;  %v1266_v42 = vpop.f32.mrf.mxu0 }
 0x18f   : > { %v2826_v43 = vpack.c.bf16 %v1073_v41, %v1069_v37  ;;  %v2986_v44 = vpack.c.bf16 %v1266_v42, %v1262_v38 }
 0x190   : > { %v1075_v45 = vpop.f32.mrf.mxu1  ;;  %v1268_v46 = vpop.f32.mrf.mxu0 }
 0x191   : > { %3137 = vst [vmem:[%s4051_s26 + $0x28] sm:$0xff] %v2826_v43   ;;  %3169 = vst [vmem:[%s4051_s26 + $0x128] sm:$0xff] %v2986_v44   ;;  %v2906_v47 = vpack.c.bf16 %v1075_v45, %v1071_v39  ;;  %v3066_v48 = vpack.c.bf16 %v1268_v46, %v1264_v40 }
 0x192   : > { %v1079_v49 = vpop.f32.mrf.mxu1  ;;  %v1272_v50 = vpop.f32.mrf.mxu0 }
 0x193   : > { %3153 = vst [vmem:[%s4051_s26 + $0xa8] sm:$0xff] %v2906_v47   ;;  %3185 = vst [vmem:[%s4051_s26 + $0x1a8] sm:$0xff] %v3066_v48  }
 0x194   : > { %v1081_v51 = vpop.f32.mrf.mxu1  ;;  %v1274_v52 = vpop.f32.mrf.mxu0 }
 0x196   : > { %v1083_v53 = vpop.f32.mrf.mxu1  ;;  %v1276_v54 = vpop.f32.mrf.mxu0 }
 0x197   : > { %v2831_v55 = vpack.c.bf16 %v1083_v53, %v1079_v49  ;;  %v2991_v56 = vpack.c.bf16 %v1276_v54, %v1272_v50 }
 0x198   : > { %v1085_v57 = vpop.f32.mrf.mxu1  ;;  %v1278_v58 = vpop.f32.mrf.mxu0 }
 0x199   : > { %3138 = vst [vmem:[%s4051_s26 + $0x30] sm:$0xff] %v2831_v55   ;;  %3170 = vst [vmem:[%s4051_s26 + $0x130] sm:$0xff] %v2991_v56   ;;  %v2911_v59 = vpack.c.bf16 %v1085_v57, %v1081_v51  ;;  %v3071_v60 = vpack.c.bf16 %v1278_v58, %v1274_v52 }
 0x19a   : > { %v1089_v61 = vpop.f32.mrf.mxu1  ;;  %v1282_v62 = vpop.f32.mrf.mxu0 }
 0x19b   : > { %3154 = vst [vmem:[%s4051_s26 + $0xb0] sm:$0xff] %v2911_v59   ;;  %3186 = vst [vmem:[%s4051_s26 + $0x1b0] sm:$0xff] %v3071_v60  }
 0x19c   : > { %v1091_v63 = vpop.f32.mrf.mxu1  ;;  %v1284_v0 = vpop.f32.mrf.mxu0 }
 0x19e   : > { %v1093_v1 = vpop.f32.mrf.mxu1  ;;  %v1286_v2 = vpop.f32.mrf.mxu0 }
 0x19f   : > { %v2836_v3 = vpack.c.bf16 %v1093_v1, %v1089_v61  ;;  %v2996_v4 = vpack.c.bf16 %v1286_v2, %v1282_v62 }
 0x1a0   : > { %v1095_v5 = vpop.f32.mrf.mxu1  ;;  %v1288_v6 = vpop.f32.mrf.mxu0 }
 0x1a1   : > { %3139 = vst [vmem:[%s4051_s26 + $0x38] sm:$0xff] %v2836_v3   ;;  %3171 = vst [vmem:[%s4051_s26 + $0x138] sm:$0xff] %v2996_v4   ;;  %v2916_v7 = vpack.c.bf16 %v1095_v5, %v1091_v63  ;;  %v3076_v8 = vpack.c.bf16 %v1288_v6, %v1284_v0 }
 0x1a2   : > { %v1099_v9 = vpop.f32.mrf.mxu1  ;;  %v1292_v10 = vpop.f32.mrf.mxu0 }
 0x1a3   : > { %3155 = vst [vmem:[%s4051_s26 + $0xb8] sm:$0xff] %v2916_v7   ;;  %3187 = vst [vmem:[%s4051_s26 + $0x1b8] sm:$0xff] %v3076_v8  }
 0x1a4   : > { %v1101_v11 = vpop.f32.mrf.mxu1  ;;  %v1294_v12 = vpop.f32.mrf.mxu0 }
 0x1a6   : > { %v1103_v13 = vpop.f32.mrf.mxu1  ;;  %v1296_v14 = vpop.f32.mrf.mxu0 }
 0x1a7   : > { %v2841_v15 = vpack.c.bf16 %v1103_v13, %v1099_v9  ;;  %v3001_v16 = vpack.c.bf16 %v1296_v14, %v1292_v10 }
 0x1a8   : > { %v1105_v17 = vpop.f32.mrf.mxu1  ;;  %v1298_v18 = vpop.f32.mrf.mxu0 }
 0x1a9   : > { %3140 = vst [vmem:[%s4051_s26 + $0x40] sm:$0xff] %v2841_v15   ;;  %3172 = vst [vmem:[%s4051_s26 + $0x140] sm:$0xff] %v3001_v16   ;;  %v2921_v19 = vpack.c.bf16 %v1105_v17, %v1101_v11  ;;  %v3081_v20 = vpack.c.bf16 %v1298_v18, %v1294_v12 }
 0x1aa   : > { %v1109_v21 = vpop.f32.mrf.mxu1  ;;  %v1302_v22 = vpop.f32.mrf.mxu0 }
 0x1ab   : > { %3156 = vst [vmem:[%s4051_s26 + $0xc0] sm:$0xff] %v2921_v19   ;;  %3188 = vst [vmem:[%s4051_s26 + $0x1c0] sm:$0xff] %v3081_v20  }
 0x1ac   : > { %v1111_v23 = vpop.f32.mrf.mxu1  ;;  %v1304_v24 = vpop.f32.mrf.mxu0 }
 0x1ae   : > { %v1113_v25 = vpop.f32.mrf.mxu1  ;;  %v1306_v26 = vpop.f32.mrf.mxu0 }
 0x1af   : > { %v2846_v27 = vpack.c.bf16 %v1113_v25, %v1109_v21  ;;  %v3006_v28 = vpack.c.bf16 %v1306_v26, %v1302_v22 }
 0x1b0   : > { %v1115_v29 = vpop.f32.mrf.mxu1  ;;  %v1308_v30 = vpop.f32.mrf.mxu0 }
 0x1b1   : > { %3141 = vst [vmem:[%s4051_s26 + $0x48] sm:$0xff] %v2846_v27   ;;  %3173 = vst [vmem:[%s4051_s26 + $0x148] sm:$0xff] %v3006_v28   ;;  %v2926_v31 = vpack.c.bf16 %v1115_v29, %v1111_v23  ;;  %v3086_v32 = vpack.c.bf16 %v1308_v30, %v1304_v24 }
 0x1b2   : > { %v1119_v33 = vpop.f32.mrf.mxu1  ;;  %v1312_v34 = vpop.f32.mrf.mxu0 }
 0x1b3   : > { %3157 = vst [vmem:[%s4051_s26 + $0xc8] sm:$0xff] %v2926_v31   ;;  %3189 = vst [vmem:[%s4051_s26 + $0x1c8] sm:$0xff] %v3086_v32  }
 0x1b4   : > { %v1121_v35 = vpop.f32.mrf.mxu1  ;;  %v1314_v36 = vpop.f32.mrf.mxu0 }
 0x1b6   : > { %v1123_v37 = vpop.f32.mrf.mxu1  ;;  %v1316_v38 = vpop.f32.mrf.mxu0 }
 0x1b7   : > { %v2851_v39 = vpack.c.bf16 %v1123_v37, %v1119_v33  ;;  %v3011_v40 = vpack.c.bf16 %v1316_v38, %v1312_v34 }
 0x1b8   : > { %v1125_v41 = vpop.f32.mrf.mxu1  ;;  %v1318_v42 = vpop.f32.mrf.mxu0 }
 0x1b9   : > { %3142 = vst [vmem:[%s4051_s26 + $0x50] sm:$0xff] %v2851_v39   ;;  %3174 = vst [vmem:[%s4051_s26 + $0x150] sm:$0xff] %v3011_v40   ;;  %v2931_v43 = vpack.c.bf16 %v1125_v41, %v1121_v35  ;;  %v3091_v44 = vpack.c.bf16 %v1318_v42, %v1314_v36 }
 0x1ba   : > { %v1129_v45 = vpop.f32.mrf.mxu1  ;;  %v1322_v46 = vpop.f32.mrf.mxu0 }
 0x1bb   : > { %3158 = vst [vmem:[%s4051_s26 + $0xd0] sm:$0xff] %v2931_v43   ;;  %3190 = vst [vmem:[%s4051_s26 + $0x1d0] sm:$0xff] %v3091_v44  }
 0x1bc   : > { %v1131_v47 = vpop.f32.mrf.mxu1  ;;  %v1324_v48 = vpop.f32.mrf.mxu0 }
 0x1be   : > { %v1133_v49 = vpop.f32.mrf.mxu1  ;;  %v1326_v50 = vpop.f32.mrf.mxu0 }
 0x1bf   : > { %v2856_v51 = vpack.c.bf16 %v1133_v49, %v1129_v45  ;;  %v3016_v52 = vpack.c.bf16 %v1326_v50, %v1322_v46 }
 0x1c0   : > { %v1135_v53 = vpop.f32.mrf.mxu1  ;;  %v1328_v54 = vpop.f32.mrf.mxu0 }
 0x1c1   : > { %3143 = vst [vmem:[%s4051_s26 + $0x58] sm:$0xff] %v2856_v51   ;;  %3175 = vst [vmem:[%s4051_s26 + $0x158] sm:$0xff] %v3016_v52   ;;  %v2936_v55 = vpack.c.bf16 %v1135_v53, %v1131_v47  ;;  %v3096_v56 = vpack.c.bf16 %v1328_v54, %v1324_v48 }
 0x1c2   : > { %v1139_v57 = vpop.f32.mrf.mxu1  ;;  %v1332_v58 = vpop.f32.mrf.mxu0 }
 0x1c3   : > { %3159 = vst [vmem:[%s4051_s26 + $0xd8] sm:$0xff] %v2936_v55   ;;  %3191 = vst [vmem:[%s4051_s26 + $0x1d8] sm:$0xff] %v3096_v56  }
 0x1c4   : > { %v1141_v59 = vpop.f32.mrf.mxu1  ;;  %v1334_v60 = vpop.f32.mrf.mxu0 }
 0x1c6   : > { %v1143_v61 = vpop.f32.mrf.mxu1  ;;  %v1336_v62 = vpop.f32.mrf.mxu0 }
 0x1c7   : > { %v2861_v63 = vpack.c.bf16 %v1143_v61, %v1139_v57  ;;  %v3021_v0 = vpack.c.bf16 %v1336_v62, %v1332_v58 }
 0x1c8   : > { %v1145_v1 = vpop.f32.mrf.mxu1  ;;  %v1338_v2 = vpop.f32.mrf.mxu0 }
 0x1c9   : > { %3144 = vst [vmem:[%s4051_s26 + $0x60] sm:$0xff] %v2861_v63   ;;  %3176 = vst [vmem:[%s4051_s26 + $0x160] sm:$0xff] %v3021_v0   ;;  %v2941_v3 = vpack.c.bf16 %v1145_v1, %v1141_v59  ;;  %v3101_v4 = vpack.c.bf16 %v1338_v2, %v1334_v60 }
 0x1ca   : > { %v1149_v5 = vpop.f32.mrf.mxu1  ;;  %v1342_v6 = vpop.f32.mrf.mxu0 }
 0x1cb   : > { %3160 = vst [vmem:[%s4051_s26 + $0xe0] sm:$0xff] %v2941_v3   ;;  %3192 = vst [vmem:[%s4051_s26 + $0x1e0] sm:$0xff] %v3101_v4  }
 0x1cc   : > { %v1151_v7 = vpop.f32.mrf.mxu1  ;;  %v1344_v8 = vpop.f32.mrf.mxu0 }
 0x1ce   : > { %v1153_v9 = vpop.f32.mrf.mxu1  ;;  %v1346_v10 = vpop.f32.mrf.mxu0 }
 0x1cf   : > { %v2866_v11 = vpack.c.bf16 %v1153_v9, %v1149_v5  ;;  %v3026_v12 = vpack.c.bf16 %v1346_v10, %v1342_v6 }
 0x1d0   : > { %v1155_v13 = vpop.f32.mrf.mxu1  ;;  %v1348_v14 = vpop.f32.mrf.mxu0 }
 0x1d1   : > { %3145 = vst [vmem:[%s4051_s26 + $0x68] sm:$0xff] %v2866_v11   ;;  %3177 = vst [vmem:[%s4051_s26 + $0x168] sm:$0xff] %v3026_v12   ;;  %v2946_v15 = vpack.c.bf16 %v1155_v13, %v1151_v7  ;;  %v3106_v16 = vpack.c.bf16 %v1348_v14, %v1344_v8 }
 0x1d2   : > { %v1159_v17 = vpop.f32.mrf.mxu1  ;;  %v1352_v18 = vpop.f32.mrf.mxu0 }
 0x1d3   : > { %3161 = vst [vmem:[%s4051_s26 + $0xe8] sm:$0xff] %v2946_v15   ;;  %3193 = vst [vmem:[%s4051_s26 + $0x1e8] sm:$0xff] %v3106_v16  }
 0x1d4   : > { %v1161_v19 = vpop.f32.mrf.mxu1  ;;  %v1354_v20 = vpop.f32.mrf.mxu0 }
 0x1d6   : > { %v1163_v21 = vpop.f32.mrf.mxu1  ;;  %v1356_v22 = vpop.f32.mrf.mxu0 }
 0x1d7   : > { %v2871_v23 = vpack.c.bf16 %v1163_v21, %v1159_v17  ;;  %v3031_v24 = vpack.c.bf16 %v1356_v22, %v1352_v18 }
 0x1d8   : > { %v1165_v25 = vpop.f32.mrf.mxu1  ;;  %v1358_v26 = vpop.f32.mrf.mxu0 }
 0x1d9   : > { %3146 = vst [vmem:[%s4051_s26 + $0x70] sm:$0xff] %v2871_v23   ;;  %3178 = vst [vmem:[%s4051_s26 + $0x170] sm:$0xff] %v3031_v24   ;;  %v2951_v27 = vpack.c.bf16 %v1165_v25, %v1161_v19  ;;  %v3111_v28 = vpack.c.bf16 %v1358_v26, %v1354_v20 }
 0x1da   : > { %v1169_v29 = vpop.f32.mrf.mxu1  ;;  %v1362_v30 = vpop.f32.mrf.mxu0 }
 0x1db   : > { %3162 = vst [vmem:[%s4051_s26 + $0xf0] sm:$0xff] %v2951_v27   ;;  %3194 = vst [vmem:[%s4051_s26 + $0x1f0] sm:$0xff] %v3111_v28  }
 0x1dc   : > { %v1171_v31 = vpop.f32.mrf.mxu1  ;;  %v1364_v32 = vpop.f32.mrf.mxu0 }
 0x1de   : > { %v1173_v33 = vpop.f32.mrf.mxu1  ;;  %v1366_v34 = vpop.f32.mrf.mxu0 }
 0x1df   : > { %v2876_v35 = vpack.c.bf16 %v1173_v33, %v1169_v29  ;;  %v3036_v36 = vpack.c.bf16 %v1366_v34, %v1362_v30 }
 0x1e0   : > { %v1175_v37 = vpop.f32.mrf.mxu1  ;;  %v1368_v38 = vpop.f32.mrf.mxu0 }
 0x1e1   : > { %3147 = vst [vmem:[%s4051_s26 + $0x78] sm:$0xff] %v2876_v35   ;;  %3179 = vst [vmem:[%s4051_s26 + $0x178] sm:$0xff] %v3036_v36   ;;  %v2956_v39 = vpack.c.bf16 %v1175_v37, %v1171_v31  ;;  %v3116_v40 = vpack.c.bf16 %v1368_v38, %v1364_v32 }
 0x1e3   : > { %3163 = vst [vmem:[%s4051_s26 + $0xf8] sm:$0xff] %v2956_v39   ;;  %3195 = vst [vmem:[%s4051_s26 + $0x1f8] sm:$0xff] %v3116_v40  }
 0x1e4   : > { %s2554_s30 = sshll.u32 %s3652_s19, 8  ;;  %s2063_s10 = sshll.u32 %s4051_s26, 4  ;;  %s2064_s10 = int_to_ptr.vmem [resolvable:$true] %s2063_s10 }
 0x1e5   : > { %s2050_s1 = sadd.s32 %s2554_s30, %s2550_s4  ;;  %s4201_s28 = sld [smem:[#allocation23_spill]] }
 0x1e6   : > { %s2555_s11 = sshll.u32 %s2050_s1, 6  ;;  %s3677_s6 = smov 2048  }
 0x1e7   : > { %3295 = sst [smem:[#allocation12]] (%p4200_p4), %s3677_s6  ;;  %s3678_s14 = smov 4096  }
 0x1e8   : > { %3296 = sst [smem:[#allocation12 + $0x1]] (%p4200_p4), %s3678_s14  ;;  %s3679_s23 = smov 32  }
 0x1e9   : > { %3297 = sst [smem:[#allocation12 + $0x2]] (%p4200_p4), %s3679_s23  ;;  %s3680_s19 = smov 64  }
 0x1ea   : > { %3298 = sst [smem:[#allocation12 + $0x3]] (%p4200_p4), %s3680_s19  ;;  %s3681_s18 = smov 4  }
 0x1eb   : > { %s2052_s7 = scalar_lea.hbm %s4201_s28, %s2555_s11  ;;  %3299 = sst [smem:[#allocation12 + $0x4]] (%p4200_p4), %s3680_s19 }
 0x1ec   : > { %3300 = sst [smem:[#allocation12 + $0x5]] (%p4200_p4), %s3681_s18  ;;  %s3682_s4 = smov 131072  }
 0x1ed   : > { %s3683_s3 = smov 0  }
 0x1ee   : > { %3301 = dma.general (%p4200_p4), %s2064_s10, 8192, %s2052_s7, %s2020_s27, %s3682_s4, [#allocation12], %s3683_s3, 0  }
 0x1ef PF: > { %s4202_s25 = sld [smem:[#allocation17_spill]]  ;;  %p3327_p6 = scmp.ge.s32.totalorder %s3664_s22, 2 }
 0x1f0   : > { %s4203_s29 = sld [smem:[#allocation18_spill]] }
 0x1f5   : > { %s2091_s24 = sand.u32 1, %s4202_s25  }
 0x1f6   : > { %p4204_p8 = scmp.ne.s32.totalorder %s4203_s29, 0  ;;  %s2092_s5 = scalar_lea.sflag [#allocation4], %s2091_s24 }
 0x1f8   : > { %p3316_p3 = pnand %p3327_p6, %p4204_p8 }
 0x1fa   : > { %p3317_p0 = pneg %p3316_p3 }
 0x1fc   : > { %3627 = dma.done.wait (%p3317_p0), %s2092_s5, 2048  }
 0x1fd   : > { %3629 = vsyncadd (%p3317_p0), %s2092_s5, 4294965248  ;;  %s2101_s26 = scalar_lea.sflag [#allocation10], %s2091_s24 }
 0x1fe   : > { %3631 = dma.done.wait (%p3317_p0), %s2101_s26, 8192  }
 0x1ff   : > { %3633 = vsyncadd (%p3317_p0), %s2101_s26, 4294959104  ;;  %s25_s22 = sadd.s32 1, %s3664_s22   ;;  %s4205_s8 = sld [smem:[#allocation19_spill]] }
 0x200   : > { %p22_p5 = scmp.ge.s32.totalorder %s25_s22, 6   ;;  %s4206_s15 = smov %s3640_s16 }
 0x201   : > { %s4207_s16 = smov %s3644_s17  ;;  %s4208_s17 = smov %s3836_s2 }
 0x202   : > { %s4209_s18 = smov %s3656_s20  ;;  %s4210_s19 = smov %s3660_s21 }
 0x203   : > { %s4212_s21 = smov %s4218_s9  ;;  %24 = sbr.rel (!%p22_p5) target bundleno = 15 (0xf), region = 110 }
 0x205   : > { %s4211_s20 = smov %s4205_s8 }
 0x208   :  { %2106 = vsyncpa [#allocation3], 1 }
 0x209   :  { %2108 = vsyncpa [#allocation3 + $0x1], 1 }
 0x20a   :  { %2109 = vsyncpa [#allocation6], 1 }
 0x20b   :  { %2110 = vsyncpa [#allocation4], 1 }
 0x20c   :  { %2112 = vsyncpa [#allocation4 + $0x1], 1 }
 0x20d   :  { %2113 = vsyncpa [#allocation10], 1 }
 0x20e   :  { %2115 = vsyncpa [#allocation10 + $0x1], 1 }

</bundles_post_ra>
